<compile_context>
chip_gen: v7x
topology: tpu7x:2x2x1
jax: 0.10.0
libtpu: 0.0.40
codegen_flags: <defaults>
</compile_context>

<pallas_src>
import functools

import jax
import jax.numpy as jnp
from jax.experimental import pallas as pl
from jax.experimental.pallas import tpu as pltpu


def _vmem_budget_bytes():
    # ~75% of physical VMEM (v5e/v6e: 128 MiB -> 96 MiB; v7x: 64 MiB -> 48 MiB).
    try:
        cap = int(pltpu.get_tpu_info().vmem_capacity_bytes)
    except Exception:
        cap = 64 << 20  # conservative fallback (v7x per-core)
    return cap * 3 // 4


def _choose_batch_tile(B, bytes_per_batch, block_budget):
    """Largest divisor TB of B such that one (TB, C, L) block fits the
    per-block budget, keeping >= 2 grid steps when B >= 2 and preferring an
    EVEN step count (balanced across v7x's 2 TensorCores)."""
    max_tb = max(1, block_budget // max(1, bytes_per_batch))
    if B >= 2:
        max_tb = min(max_tb, B // 2)  # at least 2 grid steps for megacore
    max_tb = int(max(1, min(max_tb, B)))
    best, best_even = 1, None
    for d in range(1, max_tb + 1):
        if B % d == 0:
            best = d
            if (B // d) % 2 == 0:
                best_even = d
    if best_even is not None and best_even * 2 >= best:
        return best_even
    return best


# ----------------------------- fused path kernel -----------------------------

def _se_fused_kernel(x_ref, wr_ref, br_ref, we_ref, be_ref, o_ref, *, inv_len):
    # x_ref/o_ref: (TB, C, L). wr_ref: (C, Cr), br_ref: (1, Cr),
    # we_ref: (Cr, C), be_ref: (1, C).
    # f32 accumulation only for the pooling sum; do not keep the f32 copy live.
    pooled = jnp.sum(x_ref[...].astype(jnp.float32), axis=-1) * inv_len  # (TB, C)
    r = jnp.dot(pooled, wr_ref[...],
                preferred_element_type=jnp.float32) + br_ref[...]        # (TB, Cr)
    r = jnp.maximum(r, 0.0)
    e = jnp.dot(r, we_ref[...],
                preferred_element_type=jnp.float32) + be_ref[...]        # (TB, C)
    s = jax.nn.sigmoid(e).astype(o_ref.dtype)                            # (TB, C)
    # Re-read x_ref; multiply/store in the I/O dtype (bf16-friendly).
    o_ref[...] = x_ref[...] * s[:, :, None]


# ------------------------ L-tiled two-pass fallback --------------------------

def _se_pool_kernel(x_ref, wr_ref, br_ref, we_ref, be_ref, s_ref, acc_ref,
                    *, L, TL, inv_len):
    # Grid: (B_tiles, L_tiles). acc_ref: (TB, C) f32 scratch. s_ref: (TB, C, 1).
    l = pl.program_id(1)

    @pl.when(l == 0)
    def _():
        acc_ref[...] = jnp.zeros_like(acc_ref)

    x = x_ref[...].astype(jnp.float32)                                   # (TB, C, TL)
    pos = l * TL + jax.lax.broadcasted_iota(jnp.int32, x.shape, 2)
    x = jnp.where(pos < L, x, 0.0)                                       # mask L tail
    acc_ref[...] += jnp.sum(x, axis=-1)

    @pl.when(l == pl.num_programs(1) - 1)
    def _():
        pooled = acc_ref[...] * inv_len                                  # (TB, C)
        r = jnp.dot(pooled, wr_ref[...],
                    preferred_element_type=jnp.float32) + br_ref[...]
        r = jnp.maximum(r, 0.0)
        e = jnp.dot(r, we_ref[...],
                    preferred_element_type=jnp.float32) + be_ref[...]
        s_ref[...] = jax.nn.sigmoid(e)[:, :, None]                       # (TB, C, 1)


def _se_scale_kernel(s_ref, x_ref, o_ref):
    # s_ref: (TB, C, 1); x_ref/o_ref: (TB, C, TL). Boundary stores are masked.
    s = s_ref[...].astype(o_ref.dtype)
    o_ref[...] = x_ref[...] * s


# ---------------------------------- wrapper ----------------------------------

def squeeze_excite(x, w_reduce, b_reduce, w_expand, b_expand, *,
                   block_budget_bytes=None):
    """x: (B, C, L). w_reduce: (Cr, C), b_reduce: (Cr,),
    w_expand: (C, Cr), b_expand: (C,). Returns (B, C, L) in x.dtype."""
    B, C, L = x.shape
    Cr = w_reduce.shape[0]
    itemsize = x.dtype.itemsize

    # Row-vector weight layout: (TB,C)@(C,Cr) -> (TB,Cr) -> @(Cr,C) -> (TB,C).
    wr_t = jnp.asarray(w_reduce, jnp.float32).T                 # (C, Cr)
    we_t = jnp.asarray(w_expand, jnp.float32).T                 # (Cr, C)
    br = jnp.asarray(b_reduce, jnp.float32).reshape(1, Cr)      # (1, Cr)
    be = jnp.asarray(b_expand, jnp.float32).reshape(1, C)       # (1, C)
    weight_bytes = 4 * (2 * C * Cr + Cr + C)

    budget = _vmem_budget_bytes()
    if block_budget_bytes is None:
        # 4 live pipelined x/out blocks + weights + ~25% slack must fit.
        block_budget_bytes = min(12 << 20,
                                 max(1, (budget - weight_bytes) * 3 // 16))

    inv_len = 1.0 / float(L)
    bytes_per_batch = C * L * itemsize
    wmode = pl.Buffered(1)  # invariant operands: no double buffering

    if bytes_per_batch <= block_budget_bytes:
        # ---------------- fused single-kernel path ----------------
        TB = _choose_batch_tile(B, bytes_per_batch, block_budget_bytes)
        usage = 4 * TB * bytes_per_batch + weight_bytes
        vmem_limit = int(min(budget, max(usage * 5 // 4, 16 << 20)))
        kernel = functools.partial(_se_fused_kernel, inv_len=inv_len)
        return pl.pallas_call(
            kernel,
            out_shape=jax.ShapeDtypeStruct((B, C, L), x.dtype),
            grid_spec=pltpu.PrefetchScalarGridSpec(
                num_scalar_prefetch=0,
                grid=(B // TB,),
                in_specs=[
                    pl.BlockSpec((TB, C, L), lambda b: (b, 0, 0)),        # x
                    pl.BlockSpec((C, Cr), lambda b: (0, 0),
                                 pipeline_mode=wmode),                    # w_reduce^T
                    pl.BlockSpec((1, Cr), lambda b: (0, 0),
                                 pipeline_mode=wmode),                    # b_reduce
                    pl.BlockSpec((Cr, C), lambda b: (0, 0),
                                 pipeline_mode=wmode),                    # w_expand^T
                    pl.BlockSpec((1, C), lambda b: (0, 0),
                                 pipeline_mode=wmode),                    # b_expand
                ],
                out_specs=pl.BlockSpec((TB, C, L), lambda b: (b, 0, 0)),
            ),
            compiler_params=pltpu.CompilerParams(
                dimension_semantics=("parallel",),
                vmem_limit_bytes=vmem_limit),
        )(x, wr_t, br, we_t, be)

    # ---------------- L-tiled two-pass fallback (block too big for VMEM) -----
    TB = 1
    TL = max(128, (block_budget_bytes // max(1, C * itemsize)) // 128 * 128)
    nl = pl.cdiv(L, TL)
    block_bytes = TB * C * TL * itemsize
    usage = 4 * block_bytes + weight_bytes + 8 * TB * C
    vmem_limit = int(min(budget, max(usage * 5 // 4, 16 << 20)))

    pool_kernel = functools.partial(_se_pool_kernel, L=L, TL=TL, inv_len=inv_len)
    s = pl.pallas_call(
        pool_kernel,
        out_shape=jax.ShapeDtypeStruct((B, C, 1), jnp.float32),
        grid_spec=pltpu.PrefetchScalarGridSpec(
            num_scalar_prefetch=0,
            grid=(B // TB, nl),
            in_specs=[
                pl.BlockSpec((TB, C, TL), lambda b, l: (b, 0, l)),        # x
                pl.BlockSpec((C, Cr), lambda b, l: (0, 0),
                             pipeline_mode=wmode),
                pl.BlockSpec((1, Cr), lambda b, l: (0, 0),
                             pipeline_mode=wmode),
                pl.BlockSpec((Cr, C), lambda b, l: (0, 0),
                             pipeline_mode=wmode),
                pl.BlockSpec((1, C), lambda b, l: (0, 0),
                             pipeline_mode=wmode),
            ],
            out_specs=pl.BlockSpec((TB, C, 1), lambda b, l: (b, 0, 0)),
            scratch_shapes=[pltpu.VMEM((TB, C), jnp.float32)],
        ),
        compiler_params=pltpu.CompilerParams(
            dimension_semantics=("parallel", "arbitrary"),
            vmem_limit_bytes=vmem_limit),
    )(x, wr_t, br, we_t, be)

    return pl.pallas_call(
        _se_scale_kernel,
        out_shape=jax.ShapeDtypeStruct((B, C, L), x.dtype),
        grid_spec=pltpu.PrefetchScalarGridSpec(
            num_scalar_prefetch=0,
            grid=(B // TB, nl),
            in_specs=[
                pl.BlockSpec((TB, C, 1), lambda b, l: (b, 0, 0)),         # s
                pl.BlockSpec((TB, C, TL), lambda b, l: (b, 0, l)),        # x
            ],
            out_specs=pl.BlockSpec((TB, C, TL), lambda b, l: (b, 0, l)),
        ),
        compiler_params=pltpu.CompilerParams(
            dimension_semantics=("parallel", "parallel"),
            vmem_limit_bytes=vmem_limit),
    )(s, x)


def _reference(x, w_reduce, b_reduce, w_expand, b_expand):
    pooled = jnp.mean(x, axis=-1, keepdims=True)                    # (B, C, 1)
    r = jnp.einsum("rc,bcl->brl", w_reduce, pooled) + b_reduce[None, :, None]
    r = jnp.maximum(r, 0.0)
    e = jnp.einsum("cr,brl->bcl", w_expand, r) + b_expand[None, :, None]
    s = jax.nn.sigmoid(e)
    return x * s


if __name__ == "__main__":
    # Small, deliberately unaligned shapes (C=12, L=200) exercising both the
    # fused path (B=4 -> TB=2, 2 parallel steps) and the forced L-tiled path.
    B, C, L = 4, 12, 200
    se_ratio = 0.25
    Cr = max(1, int(C * se_ratio))      # reduced_channels = 3

    key = jax.random.PRNGKey(0)
    kx, kwr, kbr, kwe, kbe = jax.random.split(key, 5)
    x = jax.random.normal(kx, (B, C, L), dtype=jnp.float32)
    # Conv1d weights are (out_ch, in_ch, 1); the kernel dim is squeezed here.
    w_reduce = 0.1 * jax.random.normal(kwr, (Cr, C), dtype=jnp.float32)
    b_reduce = 0.1 * jax.random.normal(kbr, (Cr,), dtype=jnp.float32)
    w_expand = 0.1 * jax.random.normal(kwe, (C, Cr), dtype=jnp.float32)
    b_expand = 0.1 * jax.random.normal(kbe, (C,), dtype=jnp.float32)

    ref = _reference(x, w_reduce, b_reduce, w_expand, b_expand)

    # Fused single-kernel path (auto tile selection).
    out = jax.block_until_ready(
        squeeze_excite(x, w_reduce, b_reduce, w_expand, b_expand))
    assert out.shape == ref.shape, "shape mismatch"
    assert jnp.allclose(out, ref, atol=1e-5, rtol=1e-5), "fused path mismatch"

    # Force the L-tiled two-pass fallback (the big-C*L / v7x VMEM path).
    out2 = jax.block_until_ready(
        squeeze_excite(x, w_reduce, b_reduce, w_expand, b_expand,
                       block_budget_bytes=2048))
    assert jnp.allclose(out2, ref, atol=1e-5, rtol=1e-5), "tiled path mismatch"

    print("KERNEL_OK")
</pallas_src>

<mosaic_0001>
module attributes {stable_mosaic.version = 11 : i64} {
  func.func @_se_fused_kernel(%arg0: i32, %arg1: memref<2x12x200xf32, #tpu.memory_space<vmem>>, %arg2: memref<12x3xf32, #tpu.memory_space<vmem>>, %arg3: memref<1x3xf32, #tpu.memory_space<vmem>>, %arg4: memref<3x12xf32, #tpu.memory_space<vmem>>, %arg5: memref<1x12xf32, #tpu.memory_space<vmem>>, %arg6: memref<2x12x200xf32, #tpu.memory_space<vmem>>) attributes {dimension_semantics = [#tpu.dimension_semantics<parallel>], iteration_bounds = array<i64: 2>, scalar_prefetch = 0 : i64, scratch_operands = 0 : i64, tpu.core_type = #tpu.core_type<tc>, window_params = [{transform_indices = @transform_0, window_bounds = array<i64: 2, 12, 200>}, {pipeline_mode = #tpu.pipeline_mode<synchronous>, transform_indices = @transform_1, window_bounds = array<i64: 12, 3>}, {pipeline_mode = #tpu.pipeline_mode<synchronous>, transform_indices = @transform_2, window_bounds = array<i64: 1, 3>}, {pipeline_mode = #tpu.pipeline_mode<synchronous>, transform_indices = @transform_3, window_bounds = array<i64: 3, 12>}, {pipeline_mode = #tpu.pipeline_mode<synchronous>, transform_indices = @transform_4, window_bounds = array<i64: 1, 12>}, {transform_indices = @transform_5, window_bounds = array<i64: 2, 12, 200>}]} {
    %c0 = arith.constant 0 : index
    %c0_0 = arith.constant 0 : index
    %c0_1 = arith.constant 0 : index
    %0 = vector.load %arg1[%c0, %c0_0, %c0_1] : memref<2x12x200xf32, #tpu.memory_space<vmem>>, vector<2x12x200xf32>
    %cst = arith.constant dense<0.000000e+00> : vector<2x12xf32>
    %1 = vector.multi_reduction <add>, %0, %cst [2] : vector<2x12x200xf32> to vector<2x12xf32>
    %cst_2 = arith.constant 5.000000e-03 : f32
    %2 = vector.broadcast %cst_2 : f32 to vector<2x12xf32>
    %3 = arith.mulf %1, %2 : vector<2x12xf32>
    %c0_3 = arith.constant 0 : index
    %c0_4 = arith.constant 0 : index
    %4 = vector.load %arg2[%c0_3, %c0_4] : memref<12x3xf32, #tpu.memory_space<vmem>>, vector<12x3xf32>
    %cst_5 = arith.constant dense<0.000000e+00> : vector<2x3xf32>
    %5 = tpu.matmul %3, %4, %cst_5 {dimension_numbers = #tpu.dot_dimension_numbers<[1], [0], [0], [1], [0, 0, 1, 1], [], []>} : vector<2x12xf32>, vector<12x3xf32>, vector<2x3xf32> -> vector<2x3xf32>
    %c0_6 = arith.constant 0 : index
    %c0_7 = arith.constant 0 : index
    %6 = vector.load %arg3[%c0_6, %c0_7] : memref<1x3xf32, #tpu.memory_space<vmem>>, vector<1x3xf32>
    %7 = vector.broadcast %6 : vector<1x3xf32> to vector<2x3xf32>
    %8 = arith.addf %5, %7 : vector<2x3xf32>
    %cst_8 = arith.constant 0.000000e+00 : f32
    %9 = vector.broadcast %cst_8 : f32 to vector<2x3xf32>
    %10 = arith.maximumf %8, %9 : vector<2x3xf32>
    %c0_9 = arith.constant 0 : index
    %c0_10 = arith.constant 0 : index
    %11 = vector.load %arg4[%c0_9, %c0_10] : memref<3x12xf32, #tpu.memory_space<vmem>>, vector<3x12xf32>
    %cst_11 = arith.constant dense<0.000000e+00> : vector<2x12xf32>
    %12 = tpu.matmul %10, %11, %cst_11 {dimension_numbers = #tpu.dot_dimension_numbers<[1], [0], [0], [1], [0, 0, 1, 1], [], []>} : vector<2x3xf32>, vector<3x12xf32>, vector<2x12xf32> -> vector<2x12xf32>
    %c0_12 = arith.constant 0 : index
    %c0_13 = arith.constant 0 : index
    %13 = vector.load %arg5[%c0_12, %c0_13] : memref<1x12xf32, #tpu.memory_space<vmem>>, vector<1x12xf32>
    %14 = vector.broadcast %13 : vector<1x12xf32> to vector<2x12xf32>
    %15 = arith.addf %12, %14 : vector<2x12xf32>
    %16 = arith.negf %15 : vector<2x12xf32>
    %17 = math.exp %16 : vector<2x12xf32>
    %cst_14 = arith.constant 1.000000e+00 : f32
    %18 = vector.broadcast %cst_14 : f32 to vector<2x12xf32>
    %19 = arith.addf %18, %17 : vector<2x12xf32>
    %20 = arith.divf %18, %19 : vector<2x12xf32>
    %c0_15 = arith.constant 0 : index
    %c0_16 = arith.constant 0 : index
    %c0_17 = arith.constant 0 : index
    %21 = vector.load %arg1[%c0_15, %c0_16, %c0_17] : memref<2x12x200xf32, #tpu.memory_space<vmem>>, vector<2x12x200xf32>
    %22 = vector.shape_cast %20 : vector<2x12xf32> to vector<2x12x1xf32>
    %23 = vector.broadcast %22 : vector<2x12x1xf32> to vector<2x12x200xf32>
    %24 = arith.mulf %21, %23 : vector<2x12x200xf32>
    %c0_18 = arith.constant 0 : index
    %c0_19 = arith.constant 0 : index
    %c0_20 = arith.constant 0 : index
    %25 = vector.load %arg6[%c0_18, %c0_19, %c0_20] : memref<2x12x200xf32, #tpu.memory_space<vmem>>, vector<2x12x200xf32>
    tpu.vector_store %arg6[%c0_18, %c0_19, %c0_20], %24 {strides = array<i32>} : memref<2x12x200xf32, #tpu.memory_space<vmem>>, vector<2x12x200xf32>,
    return
  }
  func.func @transform_0(%arg0: i32) -> (i32, i32, i32) {
    %c0_i32 = arith.constant 0 : i32
    %c0_i32_0 = arith.constant 0 : i32
    %c0_i32_1 = arith.constant 0 : i32
    return %arg0, %c0_i32, %c0_i32_0 : i32, i32, i32
  }
  func.func @transform_1(%arg0: i32) -> (i32, i32) {
    %c0_i32 = arith.constant 0 : i32
    %c0_i32_0 = arith.constant 0 : i32
    %c0_i32_1 = arith.constant 0 : i32
    return %c0_i32, %c0_i32_0 : i32, i32
  }
  func.func @transform_2(%arg0: i32) -> (i32, i32) {
    %c0_i32 = arith.constant 0 : i32
    %c0_i32_0 = arith.constant 0 : i32
    %c0_i32_1 = arith.constant 0 : i32
    return %c0_i32, %c0_i32_0 : i32, i32
  }
  func.func @transform_3(%arg0: i32) -> (i32, i32) {
    %c0_i32 = arith.constant 0 : i32
    %c0_i32_0 = arith.constant 0 : i32
    %c0_i32_1 = arith.constant 0 : i32
    return %c0_i32, %c0_i32_0 : i32, i32
  }
  func.func @transform_4(%arg0: i32) -> (i32, i32) {
    %c0_i32 = arith.constant 0 : i32
    %c0_i32_0 = arith.constant 0 : i32
    %c0_i32_1 = arith.constant 0 : i32
    return %c0_i32, %c0_i32_0 : i32, i32
  }
  func.func @transform_5(%arg0: i32) -> (i32, i32, i32) {
    %c0_i32 = arith.constant 0 : i32
    %c0_i32_0 = arith.constant 0 : i32
    %c0_i32_1 = arith.constant 0 : i32
    return %arg0, %c0_i32, %c0_i32_0 : i32, i32, i32
  }
}

</mosaic_0001>

<bundles_post_ra>
// kernel: tpu_custom_call.1
= control target key start
LH: loop header
LB: loop body
LE: loop exit
PB: predicated region body
PF: predicated region fallthrough
CT: control target
= control target key end

     0   :  { %s669_s18 = smov 0   ;;  %s751_s0 = inlined_call_operand.vmem [shape: f32[4,12,200], index: 0, kind: input, shape index: {}]   ;;  %s752_s1 = inlined_call_operand.vmem [shape: f32[12,3], index: 1, kind: input, shape index: {}]   ;;  %s753_s2 = inlined_call_operand.vmem [shape: f32[1,3], index: 2, kind: input, shape index: {}]   ;;  %s754_s3 = inlined_call_operand.vmem [shape: f32[3,12], index: 3, kind: input, shape index: {}]   ;;  %s755_s4 = inlined_call_operand.vmem [shape: f32[1,12], index: 4, kind: input, shape index: {}]   ;;  %s756_s5 = inlined_call_operand.vmem [shape: f32[4,12,200], index: 5, kind: output, shape index: {}]  }
   0x1 LB: > { %s568_s19 = sadd.s32 4294967295, %s633_s18   ;;  %p572_p0 = scmp.ge.s32.totalorder %s633_s18, 1  ;;  %s633_s18 = sphi %s669_s18, %s15_s18  }
   0x2   : > { %p189_p1 = scmp.lt.s32.totalorder %s633_s18, 3 }
   0x4   : > { %p190_p2 = pnand %p572_p0, %p189_p1 }
   0x5   : > { %s573_s20 = sshll.u32 (!%p190_p2), %s568_s19, 1  ;;  %vm241_vm0 = vcmask (!%p190_p2), 588800   ;;  %vm246_vm1 = vcmask (!%p190_p2), 1043456   ;;  %vm248_vm2 = vcmask (!%p190_p2), 584704   ;;  %v266_v18 = vld [vmem:[%s752_s1] sm:$0xff] (!%p190_p2)  ;;  %v635_v21 = vmov (!%p190_p2), 0.0|0.0  }
   0x6   : > { %193 = sbr.rel (%p190_p2) target bundleno = 757 (0x2f5), region = 40  ;;  %p220_p3 = scmp.lt.s32.totalorder (!%p190_p2), %s573_s20, 3  ;;  %v267_v19 = vld [vmem:[%s752_s1 + $0x8] sm:$0xf] (!%p190_p2)  ;;  %607 = vmatprep.subr.bf16.mxu0 (!%p190_p2), %v635_v21  ;;  %vm636_vm3 = vmmov (!%p190_p2), 1   ;;  %vm637_vm5 = vmmov (!%p190_p2), 0   ;;  %v279_v23 = vlaneseq (!%p190_p2) }
   0x7   : > { %v608_v20 = vpack.c.bf16 (!%p190_p2), %v267_v19, %v266_v18  ;;  %vm609_vm4 = vmpackc.low (!%p190_p2), %vm246_vm1, %vm636_vm3  ;;  %v638_v22 = vmov (!%p190_p2), 0.0   ;;  %vm290_vm6 = vcmask (!%p190_p2), 130112   ;;  %vm301_vm7 = vcmask (!%p190_p2), 1041409   ;;  %v380_v44 = vld [vmem:[%s754_s3] sm:$0x7] (!%p190_p2) }
   0x8   : > { %599 = vmatprep.mubr.msk.f32.mxu0 (!%p190_p2), %vm637_vm5, %v638_v22  ;;  %602 = vmatprep.subr.mxu1 (!%p190_p2), %v638_v22  ;;  %v280_v24 = vand.u32 (!%p190_p2), 127, %v279_v23  ;;  %v282_v25 = vshrl.u32 (!%p190_p2), %v279_v23, 7  ;;  %vm303_vm8 = vcmask (!%p190_p2), 97280   ;;  %vm392_vm9 = vcmask (!%p190_p2), 1042432   ;;  %v579_v45 = vld [vmem:[%s753_s2] ss:$0 sm:$0xff] (!%p190_p2) }
   0x9   : > { %610 = vmatpush3.bf16.msk.msra.mxu0 (!%p190_p2), %vm609_vm4, %v608_v20  ;;  %604 = vmatprep.mubr.msk.f32.mxu1 (!%p190_p2), %vm637_vm5, %v638_v22  ;;  %vm388_vm10 = vcmask (!%p190_p2), 23552   ;;  %v582_v50 = vld [vmem:[%s755_s4] ss:$0 sm:$0xff] (!%p190_p2) }
   0xa   : > { %v285_v26 = vadd.s32 (!%p190_p2), 4294967288, %v280_v24  ;;  %v283_v29 = vsub.s32 (!%p190_p2), %v280_v24, %v282_v25  ;;  %603 = vmatpush3.msk.msra.mxu1 (!%p190_p2), %vm392_vm9, %v380_v44  ;;  %v474_v57 = vsub.s32 (!%p190_p2), 0, %v282_v25  ;;  %v485_v60 = vsub.s32 (!%p190_p2), 1, %v282_v25 }
   0xc   : > { %v288_v31 = vsub.s32 (!%p190_p2), %v285_v26, %v282_v25 }
   0xd   : > { %s758_s20 = smov (!%p220_p3, %s573_s20), 3 }
   0xe   : > { %s588_s21 = sshll.u32 %s758_s20, 5 }
   0xf   : > { %s224_s24 = scalar_lea.vmem %s751_s0, %s588_s21  ;;  %s231_s12 = scalar_lea.vmem %s756_s5, %s588_s21 }
  0x10   : > { %v685_v0 = vld [vmem:[%s224_s24 + $0x20] sm:$0xff]  ;;  %v687_v1 = vld [vmem:[%s224_s24 + $0x28] sm:$0xff]  ;;  %v695_v5 = vld [vmem:[%s224_s24 + $0x30] sm:$0xf] }
  0x11   : > { %v689_v2 = vld [vmem:[%s224_s24] sm:$0xff]  ;;  %v253_v3 = vsel %vm241_vm0, %v687_v1, 0.0  ;;  %v693_v4 = vld [vmem:[%s224_s24 + $0x8] sm:$0xff]  ;;  %v697_v6 = vld [vmem:[%s224_s24 + $0x38] sm:$0xf]  ;;  %v257_v9 = vsel %vm246_vm1, %v695_v5, 0.0 }
  0x12   : > { %v254_v7 = vadd.f32 %v253_v3, %v685_v0  ;;  %v242_v8 = vsel %vm241_vm0, %v693_v4, 0.0  ;;  %v258_v10 = vsel %vm248_vm2, %v697_v6, 0.0  ;;  %v706_v11 = vld [vmem:[%s224_s24 + $0x10] sm:$0xf]  ;;  %v709_v13 = vld [vmem:[%s224_s24 + $0x18] sm:$0xf] }
  0x13   : > { %v243_v12 = vadd.f32 %v242_v8, %v689_v2  ;;  %v247_v14 = vsel %vm246_vm1, %v706_v11, 0.0  ;;  %v259_v15 = vadd.f32 %v258_v10, %v257_v9  ;;  %v249_v16 = vsel %vm248_vm2, %v709_v13, 0.0 }
  0x14   : > { %255 = vadd.xlane.f32.xlu1 %v254_v7  ;;  %v250_v17 = vadd.f32 %v249_v16, %v247_v14 }
  0x15   : > { %244 = vadd.xlane.f32.xlu0 %v243_v12 }
  0x18   : > { %260 = vadd.xlane.f32.xlu1 %v259_v15 }
  0x19   : > { %251 = vadd.xlane.f32.xlu0 %v250_v17 }
  0xa1   : > { %v256_v27 = vpop.xlane.xlu1 %255 }
  0xa2   : > { %v245_v28 = vpop.xlane.xlu0 %244  ;;  %v264_v30 = vmul.f32 0.005, %v256_v27 }
  0xa3   : > { %v262_v32 = vmul.f32 0.005, %v245_v28 }
  0xa4   : > { %v295_v37 = vrot.slane %v264_v30, %v283_v29 }
  0xa5   : > { %v261_v33 = vpop.xlane.xlu1 %260  ;;  %v284_v39 = vrot.slane %v262_v32, %v283_v29 }
  0xa6   : > { %v265_v34 = vmul.f32 0.005, %v261_v33  ;;  %v252_v35 = vpop.xlane.xlu0 %251 }
  0xa7   : > { %v263_v36 = vmul.f32 0.005, %v252_v35 }
  0xa8   : > { %v299_v38 = vrot.slane %v265_v34, %v288_v31 }
  0xa9   : > { %v289_v40 = vrot.slane %v263_v36, %v288_v31 }
  0xaa   : > { %v300_v41 = vsel %vm290_vm6, %v299_v38, %v295_v37 }
  0xab   : > { %v291_v42 = vsel %vm290_vm6, %v289_v40, %v284_v39 }
  0xac   : > { %v302_v43 = vsel %vm301_vm7, %v300_v41, %v291_v42 }
  0xad   : > { %600 = vmatmul.mubr.msk.f32.vlgmr.msra.gmra.mrb[0].mxu0 %vm303_vm8, %v302_v43 }
 0x180   : > { %v375_v46 = vpop.f32.mrb[0].mxu0 }
 0x181   : > { %v376_v47 = vadd.f32 %v579_v45, %v375_v46  ;;  %v601_v48 = vpop.f32.mrb[1].mxu0 }
 0x183   : > { %v379_v49 = vmax.f32 %v376_v47, 0.0 }
 0x185   : > { %605 = vmatmul.mubr.msk.f32.vlgmr.msra.gmra.mrb[0].mxu1 %vm388_vm10, %v379_v49 }
 0x258   : > { %v462_v51 = vpop.f32.mrb[0].mxu1 }
 0x259   : > { %v463_v52 = vadd.f32 %v582_v50, %v462_v51  ;;  %v606_v53 = vpop.f32.mrb[1].mxu1 }
 0x25b   : > { %v585_v54 = vmul.f32 -1.442695, %v463_v52 }
 0x25d   : > { %623 = vpow2.f32 %v585_v54 }
 0x267   : > { %v624_v55 = vpop.eup %623 }
 0x268   : > { %v469_v56 = vadd.f32 1.0, %v624_v55 }
 0x26a   : > { %625 = vrcp.f32 %v469_v56 }
 0x274   : > { %v626_v58 = vpop.eup %625 }
 0x275   : > { %v475_v59 = vrot.slane %v626_v58, %v474_v57  ;;  %v486_v61 = vrot.slane %v626_v58, %v485_v60 }
 0x277   : > { %481 = vbcast.lane.b32.xlu1 %v475_v59, 264  ;;  %477 = vbcast.lane.b32.xlu0 %v475_v59, 256 }
 0x27b   : > { %488 = vbcast.lane.b32.xlu1 %v486_v61, 256 }
 0x27f   : > { %492 = vbcast.lane.b32.xlu1 %v486_v61, 264 }
 0x2e9   : > { %v482_v62 = vpop.permute.xlu1 %481  ;;  %v478_v63 = vpop.permute.xlu0 %477 }
 0x2ea   : > { %v496_v3 = vmul.f32 %v482_v62, %v706_v11  ;;  %v497_v7 = vmul.f32 %v482_v62, %v709_v13  ;;  %v494_v8 = vmul.f32 %v478_v63, %v689_v2  ;;  %v495_v9 = vmul.f32 %v478_v63, %v693_v4 }
 0x2ec   : > { %504 = vst [vmem:[%s231_s12 + $0x10] sm:$0xf] %v496_v3  ;;  %505 = vst.msk [vmem:[%s231_s12 + $0x18] sm:$0xf] %vm248_vm2, %v497_v7 }
 0x2ed   : > { %502 = vst [vmem:[%s231_s12] sm:$0xff] %v494_v8  ;;  %503 = vst.msk [vmem:[%s231_s12 + $0x8] sm:$0xff] %vm241_vm0, %v495_v9  ;;  %v489_v10 = vpop.permute.xlu1 %488 }
 0x2ee   : > { %v498_v12 = vmul.f32 %v489_v10, %v685_v0  ;;  %v499_v14 = vmul.f32 %v489_v10, %v687_v1 }
 0x2f0   : > { %506 = vst [vmem:[%s231_s12 + $0x20] sm:$0xff] %v498_v12  ;;  %507 = vst.msk [vmem:[%s231_s12 + $0x28] sm:$0xff] %vm241_vm0, %v499_v14 }
 0x2f1   : > { %v493_v11 = vpop.permute.xlu1 %492 }
 0x2f2   : > { %v500_v13 = vmul.f32 %v493_v11, %v695_v5  ;;  %v501_v2 = vmul.f32 %v493_v11, %v697_v6 }
 0x2f4   : > { %508 = vst [vmem:[%s231_s12 + $0x30] sm:$0xf] %v500_v13  ;;  %509 = vst.msk [vmem:[%s231_s12 + $0x38] sm:$0xf] %vm248_vm2, %v501_v2 }
 0x2f5 PF: > { %s15_s18 = sadd.s32 1, %s633_s18  }
 0x2f6   : > { %p12_p4 = scmp.ge.s32.totalorder %s15_s18, 4  }
 0x2f8   :  { %14 = sbr.rel (!%p12_p4) target bundleno = 1 (0x1), region = 70 }

</bundles_post_ra>
